<compile_context>
chip_gen: v6e
topology: v6e:2x2x1
jax: 0.10.0
libtpu: 0.0.40
codegen_flags: <defaults>
</compile_context>

<pallas_src>
import functools

import jax
import jax.numpy as jnp
from jax.experimental import pallas as pl
from jax.experimental.pallas import tpu as pltpu


# ---------------------------------------------------------------------------
# Kernel
# ---------------------------------------------------------------------------
def _coke_bert_output_kernel(
    x_ref,      # [TM, I]    hidden-states tile, native dtype
    w_ref,      # [I, Hcp]   fused, lane-padded weight [W_text^T | W_ent^T]
    b_ref,      # [1, Hcp]   fused, lane-padded bias (f32)
    rt_ref,     # [TM, H]    residual (text), native dtype
    re_ref,     # [TM, He]   residual (entity), native dtype
    gt_ref,     # [1, Hp]    LayerNorm gamma (text), zero-padded
    bt_ref,     # [1, Hp]    LayerNorm beta  (text), zero-padded
    ge_ref,     # [1, Hep]   LayerNorm_ent gamma, zero-padded
    be_ref,     # [1, Hep]   LayerNorm_ent beta, zero-padded
    out_t_ref,  # [TM, Hp]
    out_e_ref,  # [TM, Hep]
    *pad_scratch,               # optional VMEM f32 scratch(es) for lane-padding
    h_text, h_text_pad, h_ent, h_ent_pad, eps, compute_dtype,
):
    scratch = list(pad_scratch)
    scr_t = scratch.pop(0) if h_text_pad != h_text else None
    scr_e = scratch.pop(0) if h_ent_pad != h_ent else None

    # One fused MXU matmul for both branches; bf16 operands, f32 accumulation.
    x = x_ref[...].astype(compute_dtype)
    h = jnp.dot(x, w_ref[...], preferred_element_type=jnp.float32)
    h = h + b_ref[...]                                     # padded cols stay 0

    def _residual_layernorm(h_half, r_ref, g_ref, beta_ref,
                            width, width_pad, scr, out_ref):
        r = r_ref[...].astype(jnp.float32)
        if width_pad != width:
            # Lane-pad the residual through VMEM scratch with plain masked
            # stores (re-zeroed every step: safe under "parallel" semantics).
            scr[...] = jnp.zeros_like(scr)
            scr[:, :width] = r
            r = scr[...]
        hb = h_half + r                          # padded cols are exactly 0
        inv_w = 1.0 / float(width)               # compile-time constant
        mean = jnp.sum(hb, axis=-1, keepdims=True) * inv_w
        xc = hb - mean
        if width_pad != width:
            col = jax.lax.broadcasted_iota(jnp.int32, xc.shape, 1)
            xc_m = jnp.where(col < width, xc, 0.0)   # mask pad cols out of var
        else:
            xc_m = xc
        var = jnp.sum(xc_m * xc_m, axis=-1, keepdims=True) * inv_w
        y = xc * jax.lax.rsqrt(var + eps)        # rsqrt -> EUP slot
        # gamma/beta are zero in padded cols -> padded output cols are 0.
        out_ref[...] = (y * g_ref[...] + beta_ref[...]).astype(out_ref.dtype)

    _residual_layernorm(h[:, :h_text_pad], rt_ref, gt_ref, bt_ref,
                        h_text, h_text_pad, scr_t, out_t_ref)
    _residual_layernorm(h[:, h_text_pad:], re_ref, ge_ref, be_ref,
                        h_ent, h_ent_pad, scr_e, out_e_ref)


# ---------------------------------------------------------------------------
# One-time (model-load) parameter prep: transpose + fuse + lane-pad weights.
# ---------------------------------------------------------------------------
def _round_up(n, m):
    return ((n + m - 1) // m) * m


def prepare_coke_bert_output_params(params, compute_dtype=jnp.bfloat16,
                                    lane_multiple=128):
    # lane_multiple=128 keeps both halves 128-lane aligned (lane-dense stores,
    # aligned split of the matmul result).  Use 256 on v6e/v7x if you also
    # want MXU column-tile alignment of the fused width.
    wt = jnp.asarray(params["dense_text_w"]).T.astype(jnp.float32)   # [I, H]
    we = jnp.asarray(params["dense_ent_w"]).T.astype(jnp.float32)    # [I, He]
    H, He = wt.shape[1], we.shape[1]
    Hp, Hep = _round_up(H, lane_multiple), _round_up(He, lane_multiple)

    def pad_cols(a, new_w):
        return jnp.pad(a, ((0, 0), (0, new_w - a.shape[1])))

    def pad_vec(v, new_w):
        v = jnp.asarray(v).astype(jnp.float32)
        return jnp.pad(v, (0, new_w - v.shape[0]))[None, :]

    return {
        "w_cat": jnp.concatenate([pad_cols(wt, Hp), pad_cols(we, Hep)],
                                 axis=1).astype(compute_dtype),       # [I, Hp+Hep]
        "b_cat": jnp.concatenate([pad_vec(params["dense_text_b"], Hp),
                                  pad_vec(params["dense_ent_b"], Hep)], axis=1),
        "gt": pad_vec(params["ln_text_g"], Hp),
        "bt": pad_vec(params["ln_text_b"], Hp),
        "ge": pad_vec(params["ln_ent_g"], Hep),
        "be": pad_vec(params["ln_ent_b"], Hep),
        "H": H, "He": He, "Hp": Hp, "Hep": Hep,
        "compute_dtype": compute_dtype,
    }


# ---------------------------------------------------------------------------
# Tile-size selection (generation-aware VMEM plan, corrected accounting).
# ---------------------------------------------------------------------------
def _choose_tile_m(M, resident_bytes, bytes_per_row, vmem_plan, floor_tm):
    tm = 1024
    while tm > floor_tm and resident_bytes + tm * bytes_per_row > vmem_plan:
        tm //= 2
    # Don't exceed the (sublane-rounded) problem size.
    tm = min(tm, max(floor_tm, _round_up(M, floor_tm)))
    # Prefer >=2 grid steps so "parallel" semantics can use both TCs on v7x.
    while pl.cdiv(M, tm) < 2 and tm > floor_tm:
        tm = max(floor_tm, _round_up(tm // 2, 8))
    return max(8, tm)


# ---------------------------------------------------------------------------
# Wrapper
# ---------------------------------------------------------------------------
def coke_bert_output(input_hidden_states, input_tensor_text, input_tensor_ent,
                     prepared, *, eps=1e-12, tile_m=None):
    B, S, I = input_hidden_states.shape
    H, He = prepared["H"], prepared["He"]
    Hp, Hep = prepared["Hp"], prepared["Hep"]
    Hcp = Hp + Hep
    M = B * S

    out_dtype = input_hidden_states.dtype
    # Native-dtype streams: no wrapper-side cast / pad HBM passes.
    x = input_hidden_states.reshape(M, I)
    rt = input_tensor_text.reshape(M, H)
    re = input_tensor_ent.reshape(M, He)

    x_item = x.dtype.itemsize
    rt_item = rt.dtype.itemsize
    re_item = re.dtype.itemsize
    out_item = jnp.dtype(out_dtype).itemsize

    w_cat, b_cat = prepared["w_cat"], prepared["b_cat"]
    gt, bt, ge, be = prepared["gt"], prepared["bt"], prepared["ge"], prepared["be"]

    # Generation-aware VMEM plan (~46 MiB on v7x's 64 MiB, ~92 MiB on v5e/v6e).
    try:
        vmem_cap = int(pltpu.get_tpu_info().vmem_capacity_bytes)
    except Exception:  # pragma: no cover - conservative fallback
        vmem_cap = 64 << 20
    vmem_plan = int(min(vmem_cap * 0.72, 96 << 20))

    # Resident operands are single-buffered (pl.Buffered(1)).
    resident = (w_cat.size * w_cat.dtype.itemsize
                + 4 * (b_cat.size + gt.size + bt.size + ge.size + be.size))
    per_row_stream = (I * x_item + H * rt_item + He * re_item
                      + Hp * out_item + Hep * out_item)      # double-buffered
    per_row_interm = 3 * Hcp * 4                              # f32 h + LN temps
    per_row_scratch = (Hp * 4 if Hp != H else 0) + (Hep * 4 if Hep != He else 0)
    per_row_total = 2 * per_row_stream + per_row_interm + per_row_scratch

    floor_tm = 16 if min(x_item, rt_item, re_item, out_item) < 4 else 8
    tm = tile_m if tile_m is not None else _choose_tile_m(
        M, resident, per_row_total, vmem_plan, floor_tm)

    grid = (pl.cdiv(M, tm),)                 # ragged last tile handled by Pallas

    vmem_need = resident + tm * per_row_total + (4 << 20)
    vmem_limit = int(min(max(vmem_need, 32 << 20), vmem_cap - (8 << 20)))

    kernel = functools.partial(
        _coke_bert_output_kernel,
        h_text=H, h_text_pad=Hp, h_ent=He, h_ent_pad=Hep,
        eps=eps, compute_dtype=prepared["compute_dtype"])

    def row_spec(width):                     # streamed per-row-tile blocks
        return pl.BlockSpec((tm, width), lambda i: (i, 0))

    def fixed_spec(shape):                   # VMEM-resident, single-buffered
        return pl.BlockSpec(shape, lambda i: (0, 0), pipeline_mode=pl.Buffered(1))

    scratch_shapes = []
    if Hp != H:
        scratch_shapes.append(pltpu.VMEM((tm, Hp), jnp.float32))
    if Hep != He:
        scratch_shapes.append(pltpu.VMEM((tm, Hep), jnp.float32))

    cost = pl.CostEstimate(
        flops=2 * M * I * Hcp,
        transcendentals=0,
        bytes_accessed=int(x.size * x_item
                           + w_cat.size * w_cat.dtype.itemsize
                           + rt.size * rt_item + re.size * re_item
                           + M * Hcp * out_item),
    )

    out_t, out_e = pl.pallas_call(
        kernel,
        out_shape=(jax.ShapeDtypeStruct((M, Hp), out_dtype),
                   jax.ShapeDtypeStruct((M, Hep), out_dtype)),
        grid_spec=pltpu.PrefetchScalarGridSpec(
            num_scalar_prefetch=0,
            grid=grid,
            in_specs=[
                row_spec(I),                # x tile (native dtype)
                fixed_spec((I, Hcp)),       # fused weight (resident, 1-buffered)
                fixed_spec((1, Hcp)),       # fused bias
                row_spec(H),                # residual text tile (native dtype)
                row_spec(He),               # residual ent tile (native dtype)
                fixed_spec((1, Hp)),        # gamma text
                fixed_spec((1, Hp)),        # beta text
                fixed_spec((1, Hep)),       # gamma ent
                fixed_spec((1, Hep)),       # beta ent
            ],
            out_specs=[row_spec(Hp), row_spec(Hep)],   # lane-dense stores
            scratch_shapes=scratch_shapes,
        ),
        compiler_params=pltpu.CompilerParams(
            dimension_semantics=("parallel",),         # shards M across TCs on v7x
            vmem_limit_bytes=vmem_limit,
        ),
        cost_estimate=cost,
    )(x, w_cat, b_cat, rt, re, gt, bt, ge, be)

    if Hp != H:
        out_t = out_t[:, :H]
    if Hep != He:
        out_e = out_e[:, :He]
    return out_t.reshape(B, S, H), out_e.reshape(B, S, He)


# ---------------------------------------------------------------------------
# Pure-JAX f32 reference for correctness checking.
# ---------------------------------------------------------------------------
def _reference(x, rt, re, params, eps=1e-12):
    def ln(h, g, b):
        m = jnp.mean(h, axis=-1, keepdims=True)
        v = jnp.mean((h - m) ** 2, axis=-1, keepdims=True)
        return (h - m) * jax.lax.rsqrt(v + eps) * g + b

    ht = x @ params["dense_text_w"].T + params["dense_text_b"]
    ht = ln(ht + rt, params["ln_text_g"], params["ln_text_b"])
    he = x @ params["dense_ent_w"].T + params["dense_ent_b"]
    he = ln(he + re, params["ln_ent_g"], params["ln_ent_b"])
    return ht, he


if __name__ == "__main__":
    # Small config consistent with the module:
    #   intermediate_size=64, hidden_size=32, hidden_size_ent=64
    B, S = 2, 8
    I, H, He = 64, 32, 64
    eps = 1e-12

    key = jax.random.PRNGKey(0)
    keys = jax.random.split(key, 7)

    params = {
        "dense_text_w": 0.02 * jax.random.normal(keys[0], (H, I), jnp.float32),
        "dense_text_b": 0.01 * jax.random.normal(keys[1], (H,), jnp.float32),
        "dense_ent_w": 0.02 * jax.random.normal(keys[2], (He, I), jnp.float32),
        "dense_ent_b": 0.01 * jax.random.normal(keys[3], (He,), jnp.float32),
        "ln_text_g": jnp.ones((H,), jnp.float32),
        "ln_text_b": jnp.zeros((H,), jnp.float32),
        "ln_ent_g": jnp.ones((He,), jnp.float32),
        "ln_ent_b": jnp.zeros((He,), jnp.float32),
    }

    x = jax.random.normal(keys[4], (B, S, I), jnp.float32)
    res_text = jax.random.normal(keys[5], (B, S, H), jnp.float32)
    res_ent = jax.random.normal(keys[6], (B, S, He), jnp.float32)

    prepared = prepare_coke_bert_output_params(params)   # once per model load
    out_t, out_e = coke_bert_output(x, res_text, res_ent, prepared, eps=eps)
    jax.block_until_ready((out_t, out_e))

    assert out_t.shape == (B, S, H) and out_e.shape == (B, S, He)

    ref_t, ref_e = _reference(
        x.reshape(-1, I), res_text.reshape(-1, H), res_ent.reshape(-1, He),
        params, eps)
    # bf16 MXU operands -> looser tolerance than pure-f32, still tight.
    assert jnp.allclose(out_t.reshape(-1, H), ref_t, atol=2e-2, rtol=2e-2)
    assert jnp.allclose(out_e.reshape(-1, He), ref_e, atol=2e-2, rtol=2e-2)

    print("KERNEL_OK")
</pallas_src>

<mosaic_0001>
module attributes {stable_mosaic.version = 11 : i64} {
  func.func @_coke_bert_output_kernel(%arg0: i32, %arg1: memref<8x64xf32, #tpu.memory_space<vmem>>, %arg2: memref<64x256xbf16, #tpu.memory_space<vmem>>, %arg3: memref<1x256xf32, #tpu.memory_space<vmem>>, %arg4: memref<8x32xf32, #tpu.memory_space<vmem>>, %arg5: memref<8x64xf32, #tpu.memory_space<vmem>>, %arg6: memref<1x128xf32, #tpu.memory_space<vmem>>, %arg7: memref<1x128xf32, #tpu.memory_space<vmem>>, %arg8: memref<1x128xf32, #tpu.memory_space<vmem>>, %arg9: memref<1x128xf32, #tpu.memory_space<vmem>>, %arg10: memref<8x128xf32, #tpu.memory_space<vmem>>, %arg11: memref<8x128xf32, #tpu.memory_space<vmem>>, %arg12: memref<8x128xf32, #tpu.memory_space<vmem>>, %arg13: memref<8x128xf32, #tpu.memory_space<vmem>>) attributes {dimension_semantics = [#tpu.dimension_semantics<parallel>], iteration_bounds = array<i64: 2>, scalar_prefetch = 0 : i64, scratch_operands = 2 : i64, tpu.core_type = #tpu.core_type<tc>, window_params = [{transform_indices = @transform_0, window_bounds = array<i64: 8, 64>}, {pipeline_mode = #tpu.pipeline_mode<synchronous>, transform_indices = @transform_1, window_bounds = array<i64: 64, 256>}, {pipeline_mode = #tpu.pipeline_mode<synchronous>, transform_indices = @transform_2, window_bounds = array<i64: 1, 256>}, {transform_indices = @transform_3, window_bounds = array<i64: 8, 32>}, {transform_indices = @transform_4, window_bounds = array<i64: 8, 64>}, {pipeline_mode = #tpu.pipeline_mode<synchronous>, transform_indices = @transform_5, window_bounds = array<i64: 1, 128>}, {pipeline_mode = #tpu.pipeline_mode<synchronous>, transform_indices = @transform_6, window_bounds = array<i64: 1, 128>}, {pipeline_mode = #tpu.pipeline_mode<synchronous>, transform_indices = @transform_7, window_bounds = array<i64: 1, 128>}, {pipeline_mode = #tpu.pipeline_mode<synchronous>, transform_indices = @transform_8, window_bounds = array<i64: 1, 128>}, {transform_indices = @transform_9, window_bounds = array<i64: 8, 128>}, {transform_indices = @transform_10, window_bounds = array<i64: 8, 128>}]} {
    %c0 = arith.constant 0 : index
    %c0_0 = arith.constant 0 : index
    %0 = vector.load %arg1[%c0, %c0_0] : memref<8x64xf32, #tpu.memory_space<vmem>>, vector<8x64xf32>
    %1 = arith.truncf %0 : vector<8x64xf32> to vector<8x64xbf16>
    %c0_1 = arith.constant 0 : index
    %c0_2 = arith.constant 0 : index
    %2 = vector.load %arg2[%c0_1, %c0_2] : memref<64x256xbf16, #tpu.memory_space<vmem>>, vector<64x256xbf16>
    %cst = arith.constant dense<0.000000e+00> : vector<8x256xf32>
    %3 = tpu.matmul %1, %2, %cst {dimension_numbers = #tpu.dot_dimension_numbers<[1], [0], [0], [1], [0, 0, 1, 1], [], []>} : vector<8x64xbf16>, vector<64x256xbf16>, vector<8x256xf32> -> vector<8x256xf32>
    %c0_3 = arith.constant 0 : index
    %c0_4 = arith.constant 0 : index
    %4 = vector.load %arg3[%c0_3, %c0_4] : memref<1x256xf32, #tpu.memory_space<vmem>>, vector<1x256xf32>
    %5 = vector.broadcast %4 : vector<1x256xf32> to vector<8x256xf32>
    %6 = arith.addf %3, %5 : vector<8x256xf32>
    %7 = vector.extract_strided_slice %6 {offsets = [0, 0], sizes = [8, 128], strides = [1, 1]} : vector<8x256xf32> to vector<8x128xf32>
    %c0_5 = arith.constant 0 : index
    %c0_6 = arith.constant 0 : index
    %8 = vector.load %arg4[%c0_5, %c0_6] : memref<8x32xf32, #tpu.memory_space<vmem>>, vector<8x32xf32>
    %cst_7 = arith.constant 0.000000e+00 : f32
    %9 = vector.broadcast %cst_7 : f32 to vector<8x128xf32>
    %c0_8 = arith.constant 0 : index
    %c0_9 = arith.constant 0 : index
    %10 = vector.load %arg12[%c0_8, %c0_9] : memref<8x128xf32, #tpu.memory_space<vmem>>, vector<8x128xf32>
    tpu.vector_store %arg12[%c0_8, %c0_9], %9 {strides = array<i32>} : memref<8x128xf32, #tpu.memory_space<vmem>>, vector<8x128xf32>,
    %c0_10 = arith.constant 0 : index
    %c0_11 = arith.constant 0 : index
    %11 = vector.load %arg12[%c0_10, %c0_11] : memref<8x128xf32, #tpu.memory_space<vmem>>, vector<8x32xf32>
    tpu.vector_store %arg12[%c0_10, %c0_11], %8 {strides = array<i32>} : memref<8x128xf32, #tpu.memory_space<vmem>>, vector<8x32xf32>,
    %c0_12 = arith.constant 0 : index
    %c0_13 = arith.constant 0 : index
    %12 = vector.load %arg12[%c0_12, %c0_13] : memref<8x128xf32, #tpu.memory_space<vmem>>, vector<8x128xf32>
    %13 = arith.addf %7, %12 : vector<8x128xf32>
    %cst_14 = arith.constant dense<0.000000e+00> : vector<8xf32>
    %14 = vector.multi_reduction <add>, %13, %cst_14 [1] : vector<8x128xf32> to vector<8xf32>
    %15 = vector.shape_cast %14 : vector<8xf32> to vector<8x1xf32>
    %cst_15 = arith.constant 3.125000e-02 : f32
    %16 = vector.broadcast %cst_15 : f32 to vector<8x1xf32>
    %17 = arith.mulf %15, %16 : vector<8x1xf32>
    %18 = vector.broadcast %17 : vector<8x1xf32> to vector<8x128xf32>
    %19 = arith.subf %13, %18 : vector<8x128xf32>
    %20 = tpu.iota {dimensions = array<i32: 1>} : vector<8x128xi32>
    %c32_i32 = arith.constant 32 : i32
    %21 = vector.broadcast %c32_i32 : i32 to vector<8x128xi32>
    %22 = arith.cmpi slt, %20, %21 : vector<8x128xi32>
    %cst_16 = arith.constant 0.000000e+00 : f32
    %23 = vector.broadcast %cst_16 : f32 to vector<8x128xf32>
    %24 = arith.select %22, %19, %23 : vector<8x128xi1>, vector<8x128xf32>
    %25 = arith.mulf %24, %24 : vector<8x128xf32>
    %cst_17 = arith.constant dense<0.000000e+00> : vector<8xf32>
    %26 = vector.multi_reduction <add>, %25, %cst_17 [1] : vector<8x128xf32> to vector<8xf32>
    %27 = vector.shape_cast %26 : vector<8xf32> to vector<8x1xf32>
    %cst_18 = arith.constant 3.125000e-02 : f32
    %28 = vector.broadcast %cst_18 : f32 to vector<8x1xf32>
    %29 = arith.mulf %27, %28 : vector<8x1xf32>
    %cst_19 = arith.constant 9.99999996E-13 : f32
    %30 = vector.broadcast %cst_19 : f32 to vector<8x1xf32>
    %31 = arith.addf %29, %30 : vector<8x1xf32>
    %32 = math.rsqrt %31 : vector<8x1xf32>
    %33 = vector.broadcast %32 : vector<8x1xf32> to vector<8x128xf32>
    %34 = arith.mulf %19, %33 : vector<8x128xf32>
    %c0_20 = arith.constant 0 : index
    %c0_21 = arith.constant 0 : index
    %35 = vector.load %arg6[%c0_20, %c0_21] : memref<1x128xf32, #tpu.memory_space<vmem>>, vector<1x128xf32>
    %36 = vector.broadcast %35 : vector<1x128xf32> to vector<8x128xf32>
    %37 = arith.mulf %34, %36 : vector<8x128xf32>
    %c0_22 = arith.constant 0 : index
    %c0_23 = arith.constant 0 : index
    %38 = vector.load %arg7[%c0_22, %c0_23] : memref<1x128xf32, #tpu.memory_space<vmem>>, vector<1x128xf32>
    %39 = vector.broadcast %38 : vector<1x128xf32> to vector<8x128xf32>
    %40 = arith.addf %37, %39 : vector<8x128xf32>
    %c0_24 = arith.constant 0 : index
    %c0_25 = arith.constant 0 : index
    %41 = vector.load %arg10[%c0_24, %c0_25] : memref<8x128xf32, #tpu.memory_space<vmem>>, vector<8x128xf32>
    tpu.vector_store %arg10[%c0_24, %c0_25], %40 {strides = array<i32>} : memref<8x128xf32, #tpu.memory_space<vmem>>, vector<8x128xf32>,
    %42 = vector.extract_strided_slice %6 {offsets = [0, 128], sizes = [8, 128], strides = [1, 1]} : vector<8x256xf32> to vector<8x128xf32>
    %c0_26 = arith.constant 0 : index
    %c0_27 = arith.constant 0 : index
    %43 = vector.load %arg5[%c0_26, %c0_27] : memref<8x64xf32, #tpu.memory_space<vmem>>, vector<8x64xf32>
    %cst_28 = arith.constant 0.000000e+00 : f32
    %44 = vector.broadcast %cst_28 : f32 to vector<8x128xf32>
    %c0_29 = arith.constant 0 : index
    %c0_30 = arith.constant 0 : index
    %45 = vector.load %arg13[%c0_29, %c0_30] : memref<8x128xf32, #tpu.memory_space<vmem>>, vector<8x128xf32>
    tpu.vector_store %arg13[%c0_29, %c0_30], %44 {strides = array<i32>} : memref<8x128xf32, #tpu.memory_space<vmem>>, vector<8x128xf32>,
    %c0_31 = arith.constant 0 : index
    %c0_32 = arith.constant 0 : index
    %46 = vector.load %arg13[%c0_31, %c0_32] : memref<8x128xf32, #tpu.memory_space<vmem>>, vector<8x64xf32>
    tpu.vector_store %arg13[%c0_31, %c0_32], %43 {strides = array<i32>} : memref<8x128xf32, #tpu.memory_space<vmem>>, vector<8x64xf32>,
    %c0_33 = arith.constant 0 : index
    %c0_34 = arith.constant 0 : index
    %47 = vector.load %arg13[%c0_33, %c0_34] : memref<8x128xf32, #tpu.memory_space<vmem>>, vector<8x128xf32>
    %48 = arith.addf %42, %47 : vector<8x128xf32>
    %cst_35 = arith.constant dense<0.000000e+00> : vector<8xf32>
    %49 = vector.multi_reduction <add>, %48, %cst_35 [1] : vector<8x128xf32> to vector<8xf32>
    %50 = vector.shape_cast %49 : vector<8xf32> to vector<8x1xf32>
    %cst_36 = arith.constant 1.562500e-02 : f32
    %51 = vector.broadcast %cst_36 : f32 to vector<8x1xf32>
    %52 = arith.mulf %50, %51 : vector<8x1xf32>
    %53 = vector.broadcast %52 : vector<8x1xf32> to vector<8x128xf32>
    %54 = arith.subf %48, %53 : vector<8x128xf32>
    %55 = tpu.iota {dimensions = array<i32: 1>} : vector<8x128xi32>
    %c64_i32 = arith.constant 64 : i32
    %56 = vector.broadcast %c64_i32 : i32 to vector<8x128xi32>
    %57 = arith.cmpi slt, %55, %56 : vector<8x128xi32>
    %cst_37 = arith.constant 0.000000e+00 : f32
    %58 = vector.broadcast %cst_37 : f32 to vector<8x128xf32>
    %59 = arith.select %57, %54, %58 : vector<8x128xi1>, vector<8x128xf32>
    %60 = arith.mulf %59, %59 : vector<8x128xf32>
    %cst_38 = arith.constant dense<0.000000e+00> : vector<8xf32>
    %61 = vector.multi_reduction <add>, %60, %cst_38 [1] : vector<8x128xf32> to vector<8xf32>
    %62 = vector.shape_cast %61 : vector<8xf32> to vector<8x1xf32>
    %cst_39 = arith.constant 1.562500e-02 : f32
    %63 = vector.broadcast %cst_39 : f32 to vector<8x1xf32>
    %64 = arith.mulf %62, %63 : vector<8x1xf32>
    %cst_40 = arith.constant 9.99999996E-13 : f32
    %65 = vector.broadcast %cst_40 : f32 to vector<8x1xf32>
    %66 = arith.addf %64, %65 : vector<8x1xf32>
    %67 = math.rsqrt %66 : vector<8x1xf32>
    %68 = vector.broadcast %67 : vector<8x1xf32> to vector<8x128xf32>
    %69 = arith.mulf %54, %68 : vector<8x128xf32>
    %c0_41 = arith.constant 0 : index
    %c0_42 = arith.constant 0 : index
    %70 = vector.load %arg8[%c0_41, %c0_42] : memref<1x128xf32, #tpu.memory_space<vmem>>, vector<1x128xf32>
    %71 = vector.broadcast %70 : vector<1x128xf32> to vector<8x128xf32>
    %72 = arith.mulf %69, %71 : vector<8x128xf32>
    %c0_43 = arith.constant 0 : index
    %c0_44 = arith.constant 0 : index
    %73 = vector.load %arg9[%c0_43, %c0_44] : memref<1x128xf32, #tpu.memory_space<vmem>>, vector<1x128xf32>
    %74 = vector.broadcast %73 : vector<1x128xf32> to vector<8x128xf32>
    %75 = arith.addf %72, %74 : vector<8x128xf32>
    %c0_45 = arith.constant 0 : index
    %c0_46 = arith.constant 0 : index
    %76 = vector.load %arg11[%c0_45, %c0_46] : memref<8x128xf32, #tpu.memory_space<vmem>>, vector<8x128xf32>
    tpu.vector_store %arg11[%c0_45, %c0_46], %75 {strides = array<i32>} : memref<8x128xf32, #tpu.memory_space<vmem>>, vector<8x128xf32>,
    return
  }
  func.func @transform_0(%arg0: i32) -> (i32, i32) {
    %c0_i32 = arith.constant 0 : i32
    %c0_i32_0 = arith.constant 0 : i32
    return %arg0, %c0_i32 : i32, i32
  }
  func.func @transform_1(%arg0: i32) -> (i32, i32) {
    %c0_i32 = arith.constant 0 : i32
    %c0_i32_0 = arith.constant 0 : i32
    %c0_i32_1 = arith.constant 0 : i32
    return %c0_i32, %c0_i32_0 : i32, i32
  }
  func.func @transform_2(%arg0: i32) -> (i32, i32) {
    %c0_i32 = arith.constant 0 : i32
    %c0_i32_0 = arith.constant 0 : i32
    %c0_i32_1 = arith.constant 0 : i32
    return %c0_i32, %c0_i32_0 : i32, i32
  }
  func.func @transform_3(%arg0: i32) -> (i32, i32) {
    %c0_i32 = arith.constant 0 : i32
    %c0_i32_0 = arith.constant 0 : i32
    return %arg0, %c0_i32 : i32, i32
  }
  func.func @transform_4(%arg0: i32) -> (i32, i32) {
    %c0_i32 = arith.constant 0 : i32
    %c0_i32_0 = arith.constant 0 : i32
    return %arg0, %c0_i32 : i32, i32
  }
  func.func @transform_5(%arg0: i32) -> (i32, i32) {
    %c0_i32 = arith.constant 0 : i32
    %c0_i32_0 = arith.constant 0 : i32
    %c0_i32_1 = arith.constant 0 : i32
    return %c0_i32, %c0_i32_0 : i32, i32
  }
  func.func @transform_6(%arg0: i32) -> (i32, i32) {
    %c0_i32 = arith.constant 0 : i32
    %c0_i32_0 = arith.constant 0 : i32
    %c0_i32_1 = arith.constant 0 : i32
    return %c0_i32, %c0_i32_0 : i32, i32
  }
  func.func @transform_7(%arg0: i32) -> (i32, i32) {
    %c0_i32 = arith.constant 0 : i32
    %c0_i32_0 = arith.constant 0 : i32
    %c0_i32_1 = arith.constant 0 : i32
    return %c0_i32, %c0_i32_0 : i32, i32
  }
  func.func @transform_8(%arg0: i32) -> (i32, i32) {
    %c0_i32 = arith.constant 0 : i32
    %c0_i32_0 = arith.constant 0 : i32
    %c0_i32_1 = arith.constant 0 : i32
    return %c0_i32, %c0_i32_0 : i32, i32
  }
  func.func @transform_9(%arg0: i32) -> (i32, i32) {
    %c0_i32 = arith.constant 0 : i32
    %c0_i32_0 = arith.constant 0 : i32
    return %arg0, %c0_i32 : i32, i32
  }
  func.func @transform_10(%arg0: i32) -> (i32, i32) {
    %c0_i32 = arith.constant 0 : i32
    %c0_i32_0 = arith.constant 0 : i32
    return %arg0, %c0_i32 : i32, i32
  }
}

</mosaic_0001>

<bundles_post_ra>
// kernel: tpu_custom_call.1
= control target key start
LH: loop header
LB: loop body
LE: loop exit
PB: predicated region body
PF: predicated region fallthrough
CT: control target
= control target key end

     0   :  { %s1539_s0 = inlined_call_operand.hbm [shape: f32[16,64], index: 0, kind: input, shape index: {}]   ;;  %s1540_s1 = inlined_call_operand.hbm [shape: bf16[64,256], index: 1, kind: input, shape index: {}]   ;;  %s1541_s2 = inlined_call_operand.vmem [shape: f32[1,256], index: 2, kind: input, shape index: {}]   ;;  %s1542_s3 = inlined_call_operand.hbm [shape: f32[16,32], index: 3, kind: input, shape index: {}]   ;;  %s1543_s4 = inlined_call_operand.hbm [shape: f32[16,64], index: 4, kind: input, shape index: {}]   ;;  %s1544_s5 = inlined_call_operand.vmem [shape: f32[1,128], index: 5, kind: input, shape index: {}]   ;;  %s1545_s6 = inlined_call_operand.vmem [shape: f32[1,128], index: 6, kind: input, shape index: {}]   ;;  %s1546_s7 = inlined_call_operand.vmem [shape: f32[1,128], index: 7, kind: input, shape index: {}]   ;;  %s1547_s8 = inlined_call_operand.vmem [shape: f32[1,128], index: 8, kind: input, shape index: {}]   ;;  %s1548_s9 = inlined_call_operand.hbm [shape: f32[16,128], index: 9, kind: output, shape index: {0}]   ;;  %s1549_s10 = inlined_call_operand.hbm [shape: f32[16,128], index: 10, kind: output, shape index: {1}]  }
   0x1   :  { %1561 = sst [smem:[#allocation23_spill]] %s1539_s0 }
   0x2   :  { %1562 = sst [smem:[#allocation24_spill]] %s1542_s3 }
   0x3   :  { %1563 = sst [smem:[#allocation25_spill]] %s1547_s8 }
   0x4   :  { %1564 = sst [smem:[#allocation26_spill]] %s1549_s10 }
   0x5   :  { %16 = vsyncpa [#allocation5], 0 }
   0x6   :  { %18 = vsyncpa [#allocation5 + $0x1], 0 }
   0x7   :  { %19 = vsyncpa [#allocation8], 0 }
   0x8   :  { %20 = vsyncpa [#allocation6], 0 }
   0x9   :  { %22 = vsyncpa [#allocation6 + $0x1], 0 }
   0xa   :  { %23 = vsyncpa [#allocation13], 0 }
   0xb   :  { %25 = vsyncpa [#allocation13 + $0x1], 0  ;;  %s1241_s13 = smov 0   ;;  %s1243_s14 = smov 0  }
   0xc   :  { %s1245_s15 = smov 0   ;;  %s1247_s16 = smov 0  }
   0xd LB: > { %1565 = sst [smem:[#allocation19_spill]] %s1170_s15  ;;  %s1262_s17 = sadd.s32 1, %s1174_s16   ;;  %s1174_s16 = sphi %s1247_s16, %s1590_s16   ;;  %s1170_s15 = sphi %s1245_s15, %s1592_s15   ;;  %s1166_s14 = sphi %s1243_s14, %s1594_s14   ;;  %s1162_s13 = sphi %s1241_s13, %s1593_s13  }
   0xe   : > { %1566 = sst [smem:[#allocation20_spill]] %s1174_s16  ;;  %s38_s18 = sadd.s32 1, %s1170_s15 }
   0xf   : > { %1567 = sst [smem:[#allocation21_spill]] %s1262_s17  ;;  %s35_s19 = ssub.s32 %s1174_s16, %s1262_s17 }
  0x10   : > { %p1553_p0 = scmp.ne.s32.totalorder %s1170_s15, %s1166_s14  ;;  %p36_p1 = scmp.eq.s32.totalorder %s35_s19, 0 }
  0x11   : > { %p46_p2 = scmp.eq.s32.totalorder %s1174_s16, 0  ;;  %p906_p4 = scmp.lt.s32.totalorder %s1174_s16, 2 }
  0x12   : > { %s1273_s20 = scalar_select %p36_p1, %s1170_s15, %s38_s18  }
  0x13   : > { %p47_p5 = por %p46_p2, %p1553_p0  ;;  %s333_s21 = sand.u32 1, %s1174_s16  }
  0x14   : > { %1568 = sst [smem:[#allocation22_spill]] %s1273_s20  ;;  %s335_s22 = sand.u32 1, %s1170_s15  }
  0x15   : > { %s1280_s23 = sshll.u32 %s335_s22, 3  ;;  %s1283_s24 = sshll.u32 %s1174_s16, 7 }
  0x16   : > { %s1569_s0 = sld [smem:[#allocation23_spill]]  ;;  %s337_s28 = scalar_lea.vmem [#allocation4], %s1280_s23 }
  0x17   : > { %s344_s29 = sshll.u32 %s337_s28, 4  ;;  %p1292_p6 = pnand %p906_p4, %p47_p5  ;;  %s345_s29 = int_to_ptr.vmem [resolvable:$true] %s344_s29 }
  0x18   : > { %s1571_s3 = sld [smem:[#allocation24_spill]]  ;;  %s1302_s19 = scalar_lea.sflag [#allocation5], %s333_s21 }
  0x19   : > { %p1308_p8 = pneg %p1292_p6 }
  0x1c   : > { %s1289_s27 = scalar_lea.hbm %s1569_s0, %s1283_s24  ;;  %s967_s20 = scalar_lea.hbm %s1569_s0, 256 }
  0x1d   : > { %s962_s22 = scalar_lea.hbm %s1289_s27, 128  ;;  %p968_p11 = scmp.lt.s32.totalorder %s1289_s27, %s1569_s0 }
  0x1e   : > { %s1300_s18 = scalar_lea.hbm %s1571_s3, %s1283_s24  ;;  %p963_p7 = scmp.ne.s32.totalorder %s1289_s27, %s962_s22 }
  0x1f   : > { %p969_p12 = scmp.lt.s32.totalorder %s967_s20, %s962_s22 }
  0x20   : > { %p965_p9 = pnand %p1308_p8, %p963_p7 }
  0x21   : > { %p970_p13 = por %p969_p12, %p968_p11 }
  0x22   : > { %p966_p10 = pneg %p965_p9 }
  0x24   : > { %p971_p1 = pnand %p970_p13, %p966_p10 }
  0x26   : > { %974 = shalt.err (!%p971_p1)
}
  0x27   : > { %s975_s21 = scalar_lea.vmem %s345_s29, 128  ;;  %s1176_s17 = smov [#allocation4]  }
  0x28   : > { %p976_p2 = scmp.ne.s32.totalorder %s345_s29, %s975_s21  ;;  %s980_s10 = sshll.u32 %s1176_s17, 4  ;;  %s981_s10 = int_to_ptr.vmem [resolvable:$false] %s980_s10 }
  0x29   : > { %s982_s8 = scalar_lea.vmem %s981_s10, 256  ;;  %p983_p7 = scmp.lt.s32.totalorder %s345_s29, %s981_s10 }
  0x2a   : > { %p978_p4 = pnand %p976_p2, %p1308_p8  ;;  %p984_p9 = scmp.lt.s32.totalorder %s982_s8, %s975_s21 }
  0x2c   : > { %p979_p5 = pneg %p978_p4  ;;  %p985_p3 = por %p984_p9, %p983_p7 }
  0x2e   : > { %p986_p0 = pnand %p985_p3, %p979_p5 }
  0x30   : > { %989 = shalt.err (!%p986_p0)
}
  0x31   : > { %891 = dma.hbm_to_vmem [thread:$0]  (!%p1292_p6), %s1289_s27, 128, %s345_s29, %s1302_s19  }
  0x32   : > { %s355_s20 = scalar_lea.vmem [#allocation9], %s1280_s23  ;;  %s990_s17 = scalar_lea.hbm %s1300_s18, 128 }
  0x33   : > { %s362_s22 = sshll.u32 %s355_s20, 4  ;;  %p991_p10 = scmp.ne.s32.totalorder %s1300_s18, %s990_s17  ;;  %s363_s22 = int_to_ptr.vmem [resolvable:$true] %s362_s22 }
  0x34   : > { %s995_s26 = scalar_lea.hbm %s1571_s3, 256  ;;  %p996_p0 = scmp.lt.s32.totalorder %s1300_s18, %s1571_s3 }
  0x35   : > { %p993_p11 = pnand %p991_p10, %p1308_p8  ;;  %p997_p3 = scmp.lt.s32.totalorder %s995_s26, %s990_s17 }
  0x37   : > { %p994_p12 = pneg %p993_p11  ;;  %p998_p13 = por %p997_p3, %p996_p0 }
  0x39   : > { %p999_p1 = pnand %p998_p13, %p994_p12 }
  0x3b   : > { %1002 = shalt.err (!%p999_p1)
}
  0x3c   : > { %s1003_s27 = scalar_lea.vmem %s363_s22, 128  ;;  %s1177_s29 = smov [#allocation9]  }
  0x3d   : > { %p1004_p2 = scmp.ne.s32.totalorder %s363_s22, %s1003_s27  ;;  %s1008_s12 = sshll.u32 %s1177_s29, 4  ;;  %s1009_s12 = int_to_ptr.vmem [resolvable:$false] %s1008_s12 }
  0x3e   : > { %s1010_s21 = scalar_lea.vmem %s1009_s12, 256  ;;  %p1011_p7 = scmp.lt.s32.totalorder %s363_s22, %s1009_s12 }
  0x3f   : > { %p1006_p4 = pnand %p1004_p2, %p1308_p8  ;;  %p1012_p9 = scmp.lt.s32.totalorder %s1010_s21, %s1003_s27 }
  0x41   : > { %p1007_p5 = pneg %p1006_p4  ;;  %p1013_p10 = por %p1012_p9, %p1011_p7 }
  0x43   : > { %p1014_p11 = pnand %p1013_p10, %p1007_p5 }
  0x45   : > { %1017 = shalt.err (!%p1014_p11)
}
  0x46   : > { %894 = dma.hbm_to_vmem [thread:$0]  (!%p1292_p6), %s1300_s18, 128, %s363_s22, %s1302_s19  }
  0x47   : > { %s1346_s20 = sadd.s32 4294967295, %s1174_s16   ;;  %s834_s17 = sadd.s32 4294967294, %s1174_s16  }
  0x48   : > { %p51_p12 = scmp.ne.s32.totalorder %s1166_s14, %s1162_s13  ;;  %p1554_p0 = scmp.eq.s32.totalorder %s1346_s20, 0 }
  0x49   : > { %p253_p3 = scmp.eq.s32.totalorder %s1346_s20, 1  ;;  %p259_p13 = scmp.eq.s32.totalorder %s834_s17, 1 }
  0x4a   : > { %p1355_p1 = por %p1554_p0, %p51_p12  ;;  %p835_p2 = scmp.ge.s32.totalorder %s1174_s16, 1 }
  0x4b   : > { %p1574_p4 = scmp.ne.s32.totalorder %s1170_s15, %s1166_s14  ;;  %p1367_p7 = por %p259_p13, %p51_p12 }
  0x4c   : > { %s1573_s8 = scalar_select %p1355_p1, 1, 0 }
  0x4d   : > { %p1363_p5 = por %p253_p3, %p1574_p4  ;;  %p292_p9 = scmp.lt.s32.totalorder %s1174_s16, 3 }
  0x4e   : > { %s1576_s22 = scalar_select %p1367_p7, 1, 0 }
  0x4f   : > { %s1575_s18 = scalar_select %p1363_p5, 1, 0 }
  0x50   : > { %p1372_p10 = pnand %p835_p2, %p292_p9  ;;  %s1178_s26 = smov [#allocation7]  }
  0x51   : > { %s304_s28 = sshll.u32 %s1178_s26, 4  ;;  %s1384_s29 = scalar_lea.hbm %s1543_s4, %s1283_s24  ;;  %s1376_s28 = int_to_ptr.vmem [resolvable:$true] %s304_s28 }
  0x52   : > { %s1577_s10 = scalar_select %p1372_p10, 1, 0 }
  0x53   : > { %p884_p11 = pneg %p1372_p10  ;;  %s373_s12 = scalar_lea.vmem [#allocation10], %s1280_s23 }
  0x54   : > { %s380_s21 = sshll.u32 %s373_s12, 4  ;;  %s1018_s26 = scalar_lea.hbm %s1384_s29, 128  ;;  %s381_s21 = int_to_ptr.vmem [resolvable:$true] %s380_s21 }
  0x55   : > { %p1389_p12 = pnand %p884_p11, %p1554_p0  ;;  %p1019_p3 = scmp.ne.s32.totalorder %s1384_s29, %s1018_s26 }
  0x56   : > { %s1023_s24 = scalar_lea.hbm %s1543_s4, 256  ;;  %p1024_p4 = scmp.lt.s32.totalorder %s1384_s29, %s1543_s4 }
  0x57   : > { %s1578_s17 = scalar_select %p1389_p12, 1, 0 }
  0x58   : > { %p1021_p13 = pnand %p1019_p3, %p1308_p8  ;;  %p1025_p9 = scmp.lt.s32.totalorder %s1023_s24, %s1018_s26 }
  0x5a   : > { %p1022_p2 = pneg %p1021_p13  ;;  %p1026_p7 = por %p1025_p9, %p1024_p4 }
  0x5c   : > { %p1027_p11 = pnand %p1026_p7, %p1022_p2 }
  0x5e   : > { %1030 = shalt.err (!%p1027_p11)
}
  0x5f   : > { %s1031_s23 = scalar_lea.vmem %s381_s21, 128  ;;  %s1179_s12 = smov [#allocation10]  }
  0x60   : > { %p1032_p0 = scmp.ne.s32.totalorder %s381_s21, %s1031_s23  ;;  %s1036_s15 = sshll.u32 %s1179_s12, 4  ;;  %s1037_s15 = int_to_ptr.vmem [resolvable:$false] %s1036_s15 }
  0x61   : > { %s1038_s16 = scalar_lea.vmem %s1037_s15, 256  ;;  %p1039_p3 = scmp.lt.s32.totalorder %s381_s21, %s1037_s15 }
  0x62   : > { %p1034_p5 = pnand %p1032_p0, %p1308_p8  ;;  %p1040_p13 = scmp.lt.s32.totalorder %s1038_s16, %s1031_s23 }
  0x64   : > { %p1035_p1 = pneg %p1034_p5  ;;  %p1041_p10 = por %p1040_p13, %p1039_p3 }
  0x66   : > { %p1042_p12 = pnand %p1041_p10, %p1035_p1 }
  0x68   : > { %1045 = shalt.err (!%p1042_p12)
}
  0x69   : > { %897 = dma.hbm_to_vmem [thread:$0]  (!%p1292_p6), %s1384_s29, 128, %s381_s21, %s1302_s19  }
  0x6a   : > { %p1579_p8 = scmp.ne.s32.totalorder %s1578_s17, 0  ;;  %s1057_s0 = scalar_lea.vmem %s1376_s28, 1024 }
  0x6b   : > { %p1058_p5 = scmp.ne.s32.totalorder %s1376_s28, %s1057_s0  ;;  %p1065_p4 = scmp.lt.s32.totalorder %s1376_s28, %s1376_s28 }
  0x6c   : > { %p1048_p0 = pneg %p1579_p8  ;;  %p1066_p9 = scmp.lt.s32.totalorder %s1057_s0, %s1057_s0 }
  0x6e   : > { %p1060_p7 = pnand %p1058_p5, %p1048_p0  ;;  %p1067_p1 = por %p1066_p9, %p1065_p4 }
  0x70   : > { %p1061_p2 = pneg %p1060_p7 }
  0x72   : > { %p1068_p10 = pnand %p1067_p1, %p1061_p2 }
  0x74   : > { %1071 = shalt.err (!%p1068_p10)
}
  0x75   : > { %s1180_s3 = smov 128   ;;  %s1181_s15 = smov 8  }
  0x76   : > { %887 = dma.hbm_to_vmem [thread:$0]  (!%p1579_p8), %s1540_s1, 1024, %s1376_s28, [#allocation8], %s1180_s3, %s1180_s3, %s1181_s15  }
  0x77   : > { %p1580_p6 = scmp.ne.s32.totalorder %s1577_s10, 0 }
  0x78   : > { %s391_s19 = sand.u32 (!%p1580_p6), 1, %s1346_s20   ;;  %s1426_s25 = sand.u32 (!%p1580_p6), 1, %s1166_s14  }
  0x79   : > { %389 = sbr.rel (%p1580_p6) target bundleno = 690 (0x2b2), region = 56  ;;  %s1429_s29 = sshll.u32 (!%p1580_p6), %s1426_s25, 3 }
  0x7a   : > { %s392_s21 = scalar_lea.sflag (!%p1580_p6), [#allocation5], %s391_s19  ;;  %s395_s26 = scalar_lea.vmem (!%p1580_p6), [#allocation4], %s1429_s29 }
  0x7b   : > { %p1581_p12 = scmp.ne.s32.totalorder (!%p1580_p6), %s1573_s8, 0 }
  0x7e   : > { %1141 = dma.done.wait (%p1581_p12), %s392_s21, 128  }
  0x7f   : > { %1143 = vsyncadd (%p1581_p12), %s392_s21, 4294967168  ;;  %p1582_p11 = scmp.eq.s32.totalorder %s1346_s20, 0 }
  0x81   : > { %1145 = dma.done.wait (%p1582_p11), [#allocation8], 1024   ;;  %p1583_p3 = pmov %p1582_p11 }
  0x82   : > { %s408_s10 = scalar_lea.vmem [#allocation9], %s1429_s29 }
  0x83   : > { %1147 = vsyncadd (%p1583_p3), [#allocation8], 4294966272 }
  0x84   : > { %1149 = dma.done.wait (%p1581_p12), %s392_s21, 256  }
  0x85   : > { %1151 = vsyncadd (%p1581_p12), %s392_s21, 4294967040  ;;  %v1182_v0 = vmov 0   ;;  %v1183_v1 = vmov 0.0   ;;  %v946_v2 = vld [vmem:[#allocation7 + $0x34] ss:$8 sps:$4 sm:$0xff]   ;;  %vm579_vm0 = vcmask 261120   ;;  %v482_v14 = vlaneseq }
  0x86   : > { %568 = vmatprep.mubr.bf16.mxu0 %v1182_v0  ;;  %578 = vst [vmem:[#allocation2] sm:$0xff] %v1183_v1  ;;  %616 = vst [vmem:[#allocation3] sm:$0xff] %v1183_v1  ;;  %v948_v3 = vld [vmem:[#allocation7 + $0x30] ss:$8 sps:$4 sm:$0xff]   ;;  %544 = vmatprep.subr.bf16.mxu0 %v946_v2  ;;  %v949_v4 = vld [vmem:[#allocation7 + $0x24] ss:$8 sps:$4 sm:$0xff]  }
  0x87   : > { %545 = vmatpush1.bf16.msra.mxu0 %v948_v3  ;;  %v951_v5 = vld [vmem:[#allocation7 + $0x20] ss:$8 sps:$4 sm:$0xff]   ;;  %v952_v6 = vld [vmem:[#allocation7 + $0x14] ss:$8 sps:$4 sm:$0xff]   ;;  %vm532_vm1 = vcmask 523264   ;;  %s417_s8 = scalar_lea.vmem [#allocation10], %s1429_s29 }
  0x88   : > { %546 = vmatprep.subr.bf16.mxu0 %v949_v4  ;;  %v577_v7 = vld [vmem:[%s408_s10] sm:$0xff]  ;;  %v615_v8 = vld [vmem:[%s417_s8] sm:$0xff]  ;;  %v483_v15 = vshrl.u32 %v482_v14, 7  ;;  %v588_v31 = vand.u32 127, %v482_v14  ;;  %s866_s12 = sshll.u32 %s1346_s20, 7  ;;  %s461_s0 = scalar_lea.vmem [#allocation11], %s1429_s29 }
  0x89   : > { %580 = vst.msk [vmem:[#allocation2] sm:$0xff] %vm579_vm0, %v577_v7  ;;  %v954_v9 = vld [vmem:[#allocation7 + $0x10] ss:$8 sps:$4 sm:$0xff]   ;;  %v955_v10 = vld [vmem:[#allocation7 + $0x4] ss:$8 sps:$4 sm:$0xff]   ;;  %s669_s3 = sshll.u32 %s461_s0, 4  ;;  %s1467_s21 = scalar_lea.hbm %s1548_s9, %s866_s12  ;;  %s1469_s3 = int_to_ptr.vmem [resolvable:$true] %s669_s3 }
  0x8a   : > { %617 = vst.msk [vmem:[#allocation3] sm:$0xff] %vm532_vm1, %v615_v8  ;;  %v957_v11 = vld [vmem:[#allocation7] ss:$8 sps:$4 sm:$0xff]   ;;  %v470_v12 = vld [vmem:[%s395_s26] sm:$0xff]  ;;  %v484_v16 = vsub.s32 0, %v483_v15  ;;  %v488_v18 = vsub.s32 1, %v483_v15 }
  0x8b   : > { %547 = vmatpush1.bf16.msra.mxu0 %v951_v5  ;;  %v471_v13 = vpack.c.bf16 %v470_v12, %v470_v12  ;;  %v480_v17 = vld [vmem:[%s1541_s2] sm:$0x3]  ;;  %vm589_vm2 = vcmp.lt.s32.totalorder %v588_v31, 32  ;;  %vm624_vm3 = vcmp.lt.s32.totalorder %v588_v31, 64  ;;  %s1584_s8 = sld [smem:[#allocation25_spill]]  ;;  %s468_s28 = scalar_lea.vmem [#allocation12], %s1429_s29 }
  0x8c   : > { %548 = vmatprep.subr.bf16.mxu0 %v952_v6  ;;  %v485_v19 = vrot.slane %v480_v17, %v484_v16  ;;  %v489_v20 = vrot.slane %v480_v17, %v488_v18  ;;  %v860_v49 = vld [vmem:[%s1544_s5] ss:$0 sm:$0xff]  ;;  %s1477_s17 = sshll.u32 %s468_s28, 4  ;;  %s651_s11 = scalar_lea.sflag [#allocation6], %s1426_s25  ;;  %s683_s17 = int_to_ptr.vmem [resolvable:$true] %s1477_s17 }
  0x8d   : > { %v861_v51 = vld [vmem:[%s1545_s6] ss:$0 sm:$0xff]  ;;  %s1072_s24 = scalar_lea.vmem %s1469_s3, 128  ;;  %p1585_p8 = scmp.ne.s32.totalorder %s1575_s18, 0 }
  0x8e   : > { %v862_v54 = vld [vmem:[%s1546_s7] ss:$0 sm:$0xff]  ;;  %p1073_p13 = scmp.ne.s32.totalorder %s1469_s3, %s1072_s24  ;;  %s1184_s27 = smov [#allocation11]  }
  0x8f   : > { %549 = vmatpush1.bf16.msra.mxu0 %v954_v9  ;;  %s1076_s23 = sshll.u32 %s1184_s27, 4  ;;  %s1077_s23 = int_to_ptr.vmem [resolvable:$false] %s1076_s23 }
  0x90   : > { %550 = vmatprep.subr.bf16.mxu0 %v955_v10  ;;  %v581_v22 = vld [vmem:[#allocation2] sm:$0xff]  ;;  %p1074_p0 = pnand %p1073_p13, %p1585_p8  ;;  %s1078_s15 = scalar_lea.vmem %s1077_s23, 256 }
  0x91   : > { %v618_v28 = vld [vmem:[#allocation3] sm:$0xff]  ;;  %v863_v57 = vld [vmem:[%s1584_s8] ss:$0 sm:$0xff]  ;;  %p1079_p7 = scmp.lt.s32.totalorder %s1469_s3, %s1077_s23  ;;  %p1080_p2 = scmp.lt.s32.totalorder %s1078_s15, %s1072_s24 }
  0x92   : > { %p1075_p5 = pneg %p1074_p0 }
  0x93   : > { %551 = vmatpush1.bf16.msra.mxu0 %v957_v11  ;;  %p1081_p4 = por %p1080_p2, %p1079_p7 }
  0x95   : > { %p1082_p9 = pnand %p1081_p4, %p1075_p5 }
  0x96   : > { %859 = vmatmul.mubr.msk.bf16.vlgmr.msra.gmra.mxu0 %vm532_vm1, %v471_v13 }
 0x156   : > { %v570_v21 = vpop.f32.mrf.mxu0 }
 0x157   : > { %v571_v23 = vadd.f32 %v570_v21, %v485_v19 }
 0x158   : > { %v572_v24 = vpop.f32.mrf.mxu0 }
 0x159   : > { %v573_v25 = vadd.f32 %v572_v24, %v489_v20  ;;  %v582_v26 = vadd.f32 %v581_v22, %v571_v23 }
 0x15a   : > { %v574_v27 = vpop.f32.mrf.mxu0 }
 0x15b   : > { %583 = vadd.xlane.f32.xlu0 %v582_v26  ;;  %v619_v30 = vadd.f32 %v618_v28, %v573_v25 }
 0x15c   : > { %v575_v29 = vpop.f32.mrf.mxu0 }
 0x15f   : > { %620 = vadd.xlane.f32.xlu0 %v619_v30 }
 0x1e4   : > { %v584_v32 = vpop.xlane.xlu0 %583 }
 0x1e5   : > { %v585_v33 = vmul.f32 0.03125, %v584_v32 }
 0x1e7   : > { %v586_v34 = vsub.f32 %v582_v26, %v585_v33 }
 0x1e8   : > { %v621_v35 = vpop.xlane.xlu0 %620 }
 0x1e9   : > { %v622_v36 = vmul.f32 0.015625, %v621_v35  ;;  %v590_v37 = vsel %vm589_vm2, %v586_v34, 0.0 }
 0x1ea   : > { %v591_v38 = vmul.f32 %v590_v37, %v590_v37 }
 0x1eb   : > { %v623_v39 = vsub.f32 %v619_v30, %v622_v36 }
 0x1ec   : > { %592 = vadd.xlane.f32.xlu1 %v591_v38 }
 0x1ed   : > { %v625_v40 = vsel %vm624_vm3, %v623_v39, 0.0 }
 0x1ee   : > { %v626_v41 = vmul.f32 %v625_v40, %v625_v40 }
 0x1f0   : > { %627 = vadd.xlane.f32.xlu1 %v626_v41 }
 0x275   : > { %v593_v42 = vpop.xlane.xlu1 %592 }
 0x276   : > { %v594_v43 = vmul.f32 0.03125, %v593_v42 }
 0x278   : > { %v595_v44 = vadd.f32 1e-12, %v594_v43 }
 0x279   : > { %v628_v45 = vpop.xlane.xlu1 %627 }
 0x27a   : > { %958 = vrsqrt.f32 %v595_v44  ;;  %v629_v46 = vmul.f32 0.015625, %v628_v45 }
 0x27c   : > { %v630_v47 = vadd.f32 1e-12, %v629_v46 }
 0x27e   : > { %960 = vrsqrt.f32 %v630_v47 }
 0x287   : > { %v959_v48 = vpop.eup %958 }
 0x288   : > { %v597_v50 = vmul.f32 %v959_v48, %v586_v34 }
 0x28a   : > { %v605_v52 = vmul.f32 %v860_v49, %v597_v50 }
 0x28b   : > { %v961_v53 = vpop.eup %960 }
 0x28c   : > { %v613_v55 = vadd.f32 %v861_v51, %v605_v52  ;;  %v632_v56 = vmul.f32 %v961_v53, %v623_v39 }
 0x28e   : > { %614 = vst [vmem:[%s461_s0] sm:$0xff] %v613_v55  ;;  %v640_v58 = vmul.f32 %v862_v54, %v632_v56 }
 0x28f   : > { %1085 = shalt.err (!%p1082_p9)
}
 0x290   : > { %s1086_s0 = scalar_lea.hbm %s1467_s21, 128  ;;  %s1090_s19 = scalar_lea.hbm %s1548_s9, 256 }
 0x291   : > { %p1087_p1 = scmp.ne.s32.totalorder %s1467_s21, %s1086_s0  ;;  %p1091_p12 = scmp.lt.s32.totalorder %s1467_s21, %s1548_s9 }
 0x292   : > { %p1092_p11 = scmp.lt.s32.totalorder %s1090_s19, %s1086_s0 }
 0x293   : > { %p1088_p10 = pnand %p1087_p1, %p1585_p8 }
 0x294   : > { %p1093_p3 = por %p1092_p11, %p1091_p12 }
 0x295   : > { %p1089_p6 = pneg %p1088_p10 }
 0x297   : > { %p1094_p13 = pnand %p1093_p3, %p1089_p6 }
 0x299   : > { %1097 = shalt.err (!%p1094_p13)
}
 0x29a   : > { %880 = dma.vmem_to_hbm [thread:$0]  (%p1585_p8), %s1469_s3, 128, %s1467_s21, %s651_s11   ;;  %v648_v59 = vadd.f32 %v863_v57, %v640_v58 }
 0x29b   : > { %s1586_s27 = sld [smem:[#allocation26_spill]]  ;;  %s656_s15 = scalar_lea.sflag [#allocation13], %s1426_s25 }
 0x29c   : > { %649 = vst [vmem:[%s468_s28] sm:$0xff] %v648_v59  ;;  %s1098_s0 = scalar_lea.vmem %s683_s17, 128  ;;  %s1185_s16 = smov [#allocation12]  }
 0x29d   : > { %p1099_p0 = scmp.ne.s32.totalorder %s683_s17, %s1098_s0  ;;  %s1102_s30 = sshll.u32 %s1185_s16, 4  ;;  %s1103_s30 = int_to_ptr.vmem [resolvable:$false] %s1102_s30 }
 0x29e   : > { %s1104_s19 = scalar_lea.vmem %s1103_s30, 256  ;;  %p1105_p2 = scmp.lt.s32.totalorder %s683_s17, %s1103_s30 }
 0x29f   : > { %p1100_p5 = pnand %p1099_p0, %p1585_p8  ;;  %p1106_p4 = scmp.lt.s32.totalorder %s1104_s19, %s1098_s0 }
 0x2a1   : > { %s680_s23 = scalar_lea.hbm %s1586_s27, %s866_s12  ;;  %p1101_p7 = pneg %p1100_p5 }
 0x2a2   : > { %p1107_p9 = por %p1106_p4, %p1105_p2 }
 0x2a4   : > { %p1108_p1 = pnand %p1107_p9, %p1101_p7 }
 0x2a6   : > { %1111 = shalt.err (!%p1108_p1)
}
 0x2a7   : > { %s1112_s20 = scalar_lea.hbm %s680_s23, 128  ;;  %s1116_s12 = scalar_lea.hbm %s1586_s27, 256 }
 0x2a8   : > { %p1113_p10 = scmp.ne.s32.totalorder %s680_s23, %s1112_s20  ;;  %p1117_p11 = scmp.lt.s32.totalorder %s680_s23, %s1586_s27 }
 0x2a9   : > { %p1118_p3 = scmp.lt.s32.totalorder %s1116_s12, %s1112_s20 }
 0x2aa   : > { %p1114_p6 = pnand %p1113_p10, %p1585_p8 }
 0x2ab   : > { %p1119_p13 = por %p1118_p3, %p1117_p11 }
 0x2ac   : > { %p1115_p12 = pneg %p1114_p6 }
 0x2ae   : > { %p1120_p0 = pnand %p1119_p13, %p1115_p12 }
 0x2b0   : > { %1123 = shalt.err (!%p1120_p0)
}
 0x2b1   : > { %881 = dma.vmem_to_hbm [thread:$0]  (%p1585_p8), %s683_s17, 128, %s680_s23, %s656_s15  }
 0x2b2 PF: > { %s1587_s28 = sld [smem:[#allocation20_spill]]  ;;  %s694_s11 = sand.u32 1, %s1162_s13  }
 0x2b3   : > { %p1588_p5 = scmp.ne.s32.totalorder %s1576_s22, 0  ;;  %s695_s26 = scalar_lea.sflag [#allocation6], %s694_s11 }
 0x2b8   : > { %p1589_p7 = scmp.ge.s32.totalorder %s1587_s28, 2 }
 0x2ba   : > { %p899_p2 = pnand %p1589_p7, %p1588_p5 }
 0x2bc   : > { %p900_p4 = pneg %p899_p2 }
 0x2be   : > { %1153 = dma.done.wait (%p900_p4), %s695_s26, 128  }
 0x2bf   : > { %1155 = vsyncadd (%p900_p4), %s695_s26, 4294967168  ;;  %s704_s10 = scalar_lea.sflag [#allocation13], %s694_s11 }
 0x2c0   : > { %1157 = dma.done.wait (%p900_p4), %s704_s10, 128  }
 0x2c1   : > { %1159 = vsyncadd (%p900_p4), %s704_s10, 4294967168  ;;  %s1590_s16 = sld [smem:[#allocation21_spill]]  ;;  %s1593_s13 = smov %s1166_s14 }
 0x2c2   : > { %s1591_s8 = sld [smem:[#allocation19_spill]] }
 0x2c3   : > { %s1592_s15 = sld [smem:[#allocation22_spill]] }
 0x2c7   : > { %p28_p8 = scmp.ge.s32.totalorder %s1590_s16, 4  }
 0x2c8   : > { %s1594_s14 = smov %s1591_s8 }
 0x2c9   :  { %30 = sbr.rel (!%p28_p8) target bundleno = 13 (0xd), region = 144 }
 0x2ce   :  { %709 = vsyncpa [#allocation5], 1 }
 0x2cf   :  { %711 = vsyncpa [#allocation5 + $0x1], 1 }
 0x2d0   :  { %712 = vsyncpa [#allocation8], 1 }
 0x2d1   :  { %713 = vsyncpa [#allocation6], 1 }
 0x2d2   :  { %715 = vsyncpa [#allocation6 + $0x1], 1 }
 0x2d3   :  { %716 = vsyncpa [#allocation13], 1 }
 0x2d4   :  { %718 = vsyncpa [#allocation13 + $0x1], 1 }

</bundles_post_ra>
